<compile_context>
chip_gen: v6e
topology: v6e:2x2x1
jax: 0.10.0
libtpu: 0.0.40
codegen_flags: <defaults>
</compile_context>

<pallas_src>
import functools
import math

import jax
import jax.numpy as jnp
from jax import lax
from jax.experimental import pallas as pl
from jax.experimental.pallas import tpu as pltpu

# torch nn.RMSNorm(eps=None) uses finfo(float32).eps
_EPS = float(jnp.finfo(jnp.float32).eps)


def _round_up(a, m):
    return ((a + m - 1) // m) * m


# ---------------------------------------------------------------------------
# Transformer-block kernel: grid=(batch_chunks, L).  One grid step == one layer
# over one batch chunk; residual stream carried across layers in the VMEM-
# resident output block (its BlockSpec index is constant over the L axis).
# ---------------------------------------------------------------------------
def _gpt_blocks_kernel(num_heads,
                       x_ref, ln1_ref, ln2_ref,
                       wqkv_ref, bqkv_ref, wo_ref, bo_ref,
                       wg_ref, wu_ref, wd_ref,
                       out_ref):
    layer = pl.program_id(1)
    Bc, T, C = x_ref.shape
    H = num_heads
    hd = C // H
    scale = 1.0 / math.sqrt(hd)
    bf16 = jnp.bfloat16
    f32 = jnp.float32

    # Initialize the residual-stream carry (lives in out_ref) at the first layer.
    @pl.when(layer == 0)
    def _():
        out_ref[...] = x_ref[...].astype(f32)

    x = out_ref[...]                                           # (Bc, T, C) f32

    def rms(v, w):
        return v * lax.rsqrt(jnp.mean(v * v, axis=-1, keepdims=True) + _EPS) * w

    # 2-D causal mask, broadcast in the where (no (B,T,T) iota per layer).
    row = lax.broadcasted_iota(jnp.int32, (T, T), 0)
    col = lax.broadcasted_iota(jnp.int32, (T, T), 1)
    causal = (col <= row)[None, :, :]                          # (1, T, T)

    # ---- RMSNorm 1 + causal multi-head self-attention (all heads batched) ----
    h = rms(x, ln1_ref[...])
    qkv = jnp.dot(h.astype(bf16), wqkv_ref[...],
                  preferred_element_type=f32) + bqkv_ref[...]  # (Bc, T, 3C) f32
    q = (qkv[..., 0:C] * scale).astype(bf16)                   # fold 1/sqrt(hd) into q
    k = qkv[..., C:2 * C].astype(bf16)
    v = qkv[..., 2 * C:3 * C].astype(bf16)

    def to_heads(t):                                           # (Bc,T,C) -> (Bc*H,T,hd)
        return jnp.swapaxes(t.reshape(Bc, T, H, hd), 1, 2).reshape(Bc * H, T, hd)

    q3, k3, v3 = to_heads(q), to_heads(k), to_heads(v)
    s = jnp.einsum('bqd,bkd->bqk', q3, k3,
                   preferred_element_type=f32)                 # (Bc*H, T, T) f32
    s = jnp.where(causal, s, -1e30)
    m = jnp.max(s, axis=-1, keepdims=True)
    p = jnp.exp(s - m)
    p = p * pl.reciprocal(jnp.sum(p, axis=-1, keepdims=True), approx=True)
    o = jnp.einsum('bqk,bkd->bqd', p.astype(bf16), v3,
                   preferred_element_type=f32)                 # (Bc*H, T, hd)
    y = jnp.swapaxes(o.reshape(Bc, H, T, hd), 1, 2).reshape(Bc, T, C)
    y = jnp.dot(y.astype(bf16), wo_ref[...],
                preferred_element_type=f32) + bo_ref[...]
    x = x + y

    # ---- RMSNorm 2 + SwiGLU MLP ----
    # TODO(synk): for realistic C/HID on v7x (64 MiB VMEM), tile gate/up/down over
    # HID chunks (emit_pipeline) instead of holding full per-layer MLP weights.
    h2 = rms(x, ln2_ref[...]).astype(bf16)
    gate = jnp.dot(h2, wg_ref[...], preferred_element_type=f32)
    up = jnp.dot(h2, wu_ref[...], preferred_element_type=f32)
    act = gate * (1.0 / (1.0 + jnp.exp(-gate))) * up           # SiLU(gate) * up, f32
    x = x + jnp.dot(act.astype(bf16), wd_ref[...], preferred_element_type=f32)

    out_ref[...] = x


def run_transformer_blocks(x, p, num_heads, batch_chunk=None):
    B, T, C = x.shape
    L = p["wqkv"].shape[0]
    HID = p["wg"].shape[-1]

    # Split the batch so a leading "parallel" axis can be sharded across
    # TensorCores (v7x megacore); harmless on single-TC chips.
    if batch_chunk is None:
        batch_chunk = B // 2 if (B >= 2 and B % 2 == 0) else B
    assert B % batch_chunk == 0
    nb = B // batch_chunk

    # Explicit VMEM budget: double-buffered per-layer weights + x/out blocks.
    layer_w = 2 * (C * 3 * C + C * C + 3 * C * HID)            # bf16 weights
    layer_b = 4 * (2 * C + 3 * C + C)                          # f32 ln / bias rows
    act = 4 * batch_chunk * T * C                              # one f32 activation block
    vmem_limit = int(min(110 << 20,
                         max(32 << 20, 2 * (2 * (layer_w + layer_b) + 3 * act))))

    grid_spec = pltpu.PrefetchScalarGridSpec(
        num_scalar_prefetch=0,
        grid=(nb, L),
        in_specs=[
            pl.BlockSpec((batch_chunk, T, C), lambda b, l: (b, 0, 0)),   # x (once per chunk)
            pl.BlockSpec((None, 1, C), lambda b, l: (l, 0, 0)),          # ln1
            pl.BlockSpec((None, 1, C), lambda b, l: (l, 0, 0)),          # ln2
            pl.BlockSpec((None, C, 3 * C), lambda b, l: (l, 0, 0)),      # wqkv (fused)
            pl.BlockSpec((None, 1, 3 * C), lambda b, l: (l, 0, 0)),      # bqkv
            pl.BlockSpec((None, C, C), lambda b, l: (l, 0, 0)),          # wo
            pl.BlockSpec((None, 1, C), lambda b, l: (l, 0, 0)),          # bo
            pl.BlockSpec((None, C, HID), lambda b, l: (l, 0, 0)),        # wg
            pl.BlockSpec((None, C, HID), lambda b, l: (l, 0, 0)),        # wu
            pl.BlockSpec((None, HID, C), lambda b, l: (l, 0, 0)),        # wd
        ],
        out_specs=pl.BlockSpec((batch_chunk, T, C), lambda b, l: (b, 0, 0)),
    )
    return pl.pallas_call(
        functools.partial(_gpt_blocks_kernel, num_heads),
        out_shape=jax.ShapeDtypeStruct((B, T, C), jnp.float32),
        grid_spec=grid_spec,
        compiler_params=pltpu.CompilerParams(
            dimension_semantics=("parallel", "arbitrary"),
            vmem_limit_bytes=vmem_limit),
    )(x, p["ln1"], p["ln2"],
      p["wqkv"], p["bqkv"], p["wo"], p["bo"],
      p["wg"], p["wu"], p["wd"])


# ---------------------------------------------------------------------------
# LM head kernel: logits = x @ W + b, tiled (lane-dense) over the vocab dim.
# ---------------------------------------------------------------------------
def _lm_head_kernel(x_ref, w_ref, b_ref, o_ref):
    o_ref[...] = (jnp.dot(x_ref[...].astype(jnp.bfloat16), w_ref[...],
                          preferred_element_type=jnp.float32)
                  + b_ref[...]).astype(o_ref.dtype)


def lm_head(x, w, b, tile_v=1024):
    BT, C = x.shape
    V = w.shape[-1]
    # Lane-dense vocab tiles; pad V so every tile is full width (never fall back
    # to loading the whole (C, V) weight as a single block).
    tile_v = min(tile_v, _round_up(V, 128))
    V_pad = _round_up(V, tile_v)
    if V_pad != V:
        w = jnp.pad(w, ((0, 0), (0, V_pad - V)))
        b = jnp.pad(b, ((0, 0), (0, V_pad - V)))
    nv = V_pad // tile_v

    vmem_limit = int(min(110 << 20,
                         max(32 << 20,
                             2 * (2 * (2 * C * tile_v + 4 * tile_v)   # db weight + bias tiles
                                  + 4 * BT * C                         # resident x block
                                  + 2 * 4 * BT * tile_v))))            # db output tiles

    grid_spec = pltpu.PrefetchScalarGridSpec(
        num_scalar_prefetch=0,
        grid=(nv,),
        in_specs=[
            pl.BlockSpec((BT, C), lambda j: (0, 0)),
            pl.BlockSpec((C, tile_v), lambda j: (0, j)),
            pl.BlockSpec((1, tile_v), lambda j: (0, j)),
        ],
        out_specs=pl.BlockSpec((BT, tile_v), lambda j: (0, j)),
    )
    out = pl.pallas_call(
        _lm_head_kernel,
        out_shape=jax.ShapeDtypeStruct((BT, V_pad), jnp.float32),
        grid_spec=grid_spec,
        compiler_params=pltpu.CompilerParams(
            dimension_semantics=("parallel",),
            vmem_limit_bytes=vmem_limit),
    )(x, w, b)
    return out[:, :V] if V_pad != V else out


# ---------------------------------------------------------------------------
# Full GPT forward (embedding gather is plain-JAX glue; hot path in Pallas).
# ---------------------------------------------------------------------------
def gpt_forward(idx, params, num_heads):
    # TODO(synk): token/position embedding gather has no clean Pallas tiling at
    # this tiny scale; done in plain JAX.
    B, T = idx.shape
    tok = jnp.take(params["tok_emb"], idx, axis=0)            # (B, T, C)
    pos = params["pos_emb"][:T][None, :, :]                   # (1, T, C)
    x = (tok + pos).astype(jnp.float32)
    x = run_transformer_blocks(x, params, num_heads)          # (B, T, C) f32
    B_, T_, C = x.shape
    logits = lm_head(x.reshape(B * T, C), params["lm_w"], params["lm_b"])
    return logits.reshape(B, T, -1)                           # (B, T, V)


# ---------------------------------------------------------------------------
# Deterministic synthetic parameters + pure-JAX reference for validation.
# ---------------------------------------------------------------------------
def init_params(key, vocab_size, block_size, L, C, H, mult):
    HID = mult * C
    ks = jax.random.split(key, 12)
    s = 0.05
    bf = jnp.bfloat16

    def rnd(k, shape, dtype=jnp.float32):
        return (s * jax.random.normal(k, shape)).astype(dtype)

    return dict(
        tok_emb=rnd(ks[0], (vocab_size, C)),
        pos_emb=rnd(ks[1], (block_size, C)),
        ln1=jnp.ones((L, 1, C), jnp.float32),   # RMSNorm weight init = ones
        ln2=jnp.ones((L, 1, C), jnp.float32),
        wqkv=rnd(ks[2], (L, C, 3 * C), bf),     # fused q|k|v, pre-transposed (in,out), bf16
        bqkv=rnd(ks[3], (L, 1, 3 * C)),
        wo=rnd(ks[4], (L, C, C), bf),
        bo=rnd(ks[5], (L, 1, C)),
        wg=rnd(ks[6], (L, C, HID), bf),
        wu=rnd(ks[7], (L, C, HID), bf),
        wd=rnd(ks[8], (L, HID, C), bf),
        lm_w=rnd(ks[9], (C, vocab_size), bf),
        lm_b=rnd(ks[10], (1, vocab_size)),
    )


def ref_forward(idx, p, num_heads):
    """Pure-JAX reference mirroring the kernel's math (bf16 MXU operands, f32 accum)."""
    B, T = idx.shape
    C = p["tok_emb"].shape[-1]
    hd = C // num_heads
    scale = 1.0 / math.sqrt(hd)
    L = p["wqkv"].shape[0]
    bf = jnp.bfloat16
    f32 = jnp.float32

    x = (jnp.take(p["tok_emb"], idx, axis=0) + p["pos_emb"][:T][None]).astype(f32)
    causal = (jnp.arange(T)[None, :] <= jnp.arange(T)[:, None])[None]      # (1, T, T)

    def rms(v, w):
        return v * lax.rsqrt(jnp.mean(v * v, -1, keepdims=True) + _EPS) * w

    for l in range(L):
        h = rms(x, p["ln1"][l])
        qkv = jnp.einsum('btc,cd->btd', h.astype(bf), p["wqkv"][l],
                         preferred_element_type=f32) + p["bqkv"][l]
        q = (qkv[..., 0:C] * scale).astype(bf).reshape(B, T, num_heads, hd)
        k = qkv[..., C:2 * C].astype(bf).reshape(B, T, num_heads, hd)
        v = qkv[..., 2 * C:3 * C].astype(bf).reshape(B, T, num_heads, hd)
        s = jnp.einsum('bqhd,bkhd->bhqk', q, k, preferred_element_type=f32)
        s = jnp.where(causal[:, None], s, -1e30)
        a = jax.nn.softmax(s, axis=-1)
        o = jnp.einsum('bhqk,bkhd->bqhd', a.astype(bf), v, preferred_element_type=f32)
        y = o.reshape(B, T, C)
        y = jnp.einsum('btc,cd->btd', y.astype(bf), p["wo"][l],
                       preferred_element_type=f32) + p["bo"][l]
        x = x + y
        h2 = rms(x, p["ln2"][l]).astype(bf)
        gate = jnp.einsum('btc,ch->bth', h2, p["wg"][l], preferred_element_type=f32)
        up = jnp.einsum('btc,ch->bth', h2, p["wu"][l], preferred_element_type=f32)
        act = jax.nn.silu(gate) * up
        x = x + jnp.einsum('bth,hc->btc', act.astype(bf), p["wd"][l],
                           preferred_element_type=f32)
    return jnp.einsum('btc,cv->btv', x.astype(bf), p["lm_w"],
                      preferred_element_type=f32) + p["lm_b"]


if __name__ == "__main__":
    # Small GPT config consistent with the module's constructor.
    vocab_size, block_size = 64, 16
    num_layers, embed_dim, num_heads, mlp_mult = 2, 32, 4, 4
    B, T = 2, 8

    key = jax.random.PRNGKey(0)
    pkey, ikey = jax.random.split(key)
    params = init_params(pkey, vocab_size, block_size,
                         num_layers, embed_dim, num_heads, mlp_mult)
    idx = jax.random.randint(ikey, (B, T), 0, vocab_size, dtype=jnp.int32)

    logits = jax.block_until_ready(gpt_forward(idx, params, num_heads))
    assert logits.shape == (B, T, vocab_size)

    ref = jax.block_until_ready(ref_forward(idx, params, num_heads))
    max_diff = float(jnp.max(jnp.abs(logits - ref)))
    assert jnp.allclose(logits, ref, rtol=2e-2, atol=3e-3), max_diff

    print("KERNEL_OK")
</pallas_src>

<mosaic_0001>
module attributes {stable_mosaic.version = 11 : i64} {
  func.func @_gpt_blocks_kernel(%arg0: i32, %arg1: i32, %arg2: memref<1x8x32xf32, #tpu.memory_space<vmem>>, %arg3: memref<1x1x32xf32, #tpu.memory_space<vmem>>, %arg4: memref<1x1x32xf32, #tpu.memory_space<vmem>>, %arg5: memref<1x32x96xbf16, #tpu.memory_space<vmem>>, %arg6: memref<1x1x96xf32, #tpu.memory_space<vmem>>, %arg7: memref<1x32x32xbf16, #tpu.memory_space<vmem>>, %arg8: memref<1x1x32xf32, #tpu.memory_space<vmem>>, %arg9: memref<1x32x128xbf16, #tpu.memory_space<vmem>>, %arg10: memref<1x32x128xbf16, #tpu.memory_space<vmem>>, %arg11: memref<1x128x32xbf16, #tpu.memory_space<vmem>>, %arg12: memref<1x8x32xf32, #tpu.memory_space<vmem>>) attributes {dimension_semantics = [#tpu.dimension_semantics<parallel>, #tpu.dimension_semantics<arbitrary>], iteration_bounds = array<i64: 2, 2>, scalar_prefetch = 0 : i64, scratch_operands = 0 : i64, tpu.core_type = #tpu.core_type<tc>, window_params = [{transform_indices = @transform_0, window_bounds = array<i64: 1, 8, 32>}, {transform_indices = @transform_1, window_bounds = array<i64: 1, 1, 32>}, {transform_indices = @transform_2, window_bounds = array<i64: 1, 1, 32>}, {transform_indices = @transform_3, window_bounds = array<i64: 1, 32, 96>}, {transform_indices = @transform_4, window_bounds = array<i64: 1, 1, 96>}, {transform_indices = @transform_5, window_bounds = array<i64: 1, 32, 32>}, {transform_indices = @transform_6, window_bounds = array<i64: 1, 1, 32>}, {transform_indices = @transform_7, window_bounds = array<i64: 1, 32, 128>}, {transform_indices = @transform_8, window_bounds = array<i64: 1, 32, 128>}, {transform_indices = @transform_9, window_bounds = array<i64: 1, 128, 32>}, {transform_indices = @transform_10, window_bounds = array<i64: 1, 8, 32>}]} {
    %c0_i32 = arith.constant 0 : i32
    %0 = arith.cmpi eq, %arg1, %c0_i32 : i32
    %1 = arith.extui %0 : i1 to i32
    %c0_i32_0 = arith.constant 0 : i32
    %2 = arith.cmpi ne, %1, %c0_i32_0 : i32
    scf.if %2 {
      %c0_52 = arith.constant 0 : index
      %c0_53 = arith.constant 0 : index
      %c0_54 = arith.constant 0 : index
      %116 = vector.load %arg2[%c0_52, %c0_53, %c0_54] : memref<1x8x32xf32, #tpu.memory_space<vmem>>, vector<1x8x32xf32>
      %c0_55 = arith.constant 0 : index
      %c0_56 = arith.constant 0 : index
      %c0_57 = arith.constant 0 : index
      %117 = vector.load %arg12[%c0_55, %c0_56, %c0_57] : memref<1x8x32xf32, #tpu.memory_space<vmem>>, vector<1x8x32xf32>
      tpu.vector_store %arg12[%c0_55, %c0_56, %c0_57], %116 {strides = array<i32>} : memref<1x8x32xf32, #tpu.memory_space<vmem>>, vector<1x8x32xf32>,
    } else {
    }
    %c0 = arith.constant 0 : index
    %c0_1 = arith.constant 0 : index
    %c0_2 = arith.constant 0 : index
    %3 = vector.load %arg12[%c0, %c0_1, %c0_2] : memref<1x8x32xf32, #tpu.memory_space<vmem>>, vector<1x8x32xf32>
    %4 = tpu.iota {dimensions = array<i32: 0>} : vector<8x8xi32>
    %5 = tpu.iota {dimensions = array<i32: 1>} : vector<8x8xi32>
    %6 = arith.cmpi sle, %5, %4 : vector<8x8xi32>
    %7 = vector.shape_cast %6 : vector<8x8xi1> to vector<1x8x8xi1>
    %c0_3 = arith.constant 0 : index
    %c0_4 = arith.constant 0 : index
    %c0_5 = arith.constant 0 : index
    %8 = vector.load %arg3[%c0_3, %c0_4, %c0_5] : memref<1x1x32xf32, #tpu.memory_space<vmem>>, vector<1x1x32xf32>
    %9 = vector.shape_cast %8 : vector<1x1x32xf32> to vector<1x32xf32>
    %10 = arith.mulf %3, %3 : vector<1x8x32xf32>
    %cst = arith.constant dense<0.000000e+00> : vector<1x8xf32>
    %11 = vector.multi_reduction <add>, %10, %cst [2] : vector<1x8x32xf32> to vector<1x8xf32>
    %12 = vector.shape_cast %11 : vector<1x8xf32> to vector<1x8x1xf32>
    %cst_6 = arith.constant 3.200000e+01 : f32
    %13 = vector.broadcast %cst_6 : f32 to vector<1x8x1xf32>
    %14 = arith.divf %12, %13 : vector<1x8x1xf32>
    %cst_7 = arith.constant 1.1920929E-7 : f32
    %15 = vector.broadcast %cst_7 : f32 to vector<1x8x1xf32>
    %16 = arith.addf %14, %15 : vector<1x8x1xf32>
    %17 = math.rsqrt %16 : vector<1x8x1xf32>
    %18 = vector.broadcast %17 : vector<1x8x1xf32> to vector<1x8x32xf32>
    %19 = arith.mulf %3, %18 : vector<1x8x32xf32>
    %20 = vector.shape_cast %9 : vector<1x32xf32> to vector<1x1x32xf32>
    %21 = vector.broadcast %20 : vector<1x1x32xf32> to vector<1x8x32xf32>
    %22 = arith.mulf %19, %21 : vector<1x8x32xf32>
    %23 = arith.truncf %22 : vector<1x8x32xf32> to vector<1x8x32xbf16>
    %c0_8 = arith.constant 0 : index
    %c0_9 = arith.constant 0 : index
    %c0_10 = arith.constant 0 : index
    %24 = vector.load %arg5[%c0_8, %c0_9, %c0_10] : memref<1x32x96xbf16, #tpu.memory_space<vmem>>, vector<1x32x96xbf16>
    %25 = vector.shape_cast %24 : vector<1x32x96xbf16> to vector<32x96xbf16>
    %cst_11 = arith.constant dense<0.000000e+00> : vector<1x8x96xf32>
    %26 = tpu.matmul %23, %25, %cst_11 {dimension_numbers = #tpu.dot_dimension_numbers<[2], [0], [0, 1], [1], [0, 0, 0, 1, 1, 1], [], []>} : vector<1x8x32xbf16>, vector<32x96xbf16>, vector<1x8x96xf32> -> vector<1x8x96xf32>
    %c0_12 = arith.constant 0 : index
    %c0_13 = arith.constant 0 : index
    %c0_14 = arith.constant 0 : index
    %27 = vector.load %arg6[%c0_12, %c0_13, %c0_14] : memref<1x1x96xf32, #tpu.memory_space<vmem>>, vector<1x1x96xf32>
    %28 = vector.shape_cast %27 : vector<1x1x96xf32> to vector<1x96xf32>
    %29 = vector.shape_cast %28 : vector<1x96xf32> to vector<1x1x96xf32>
    %30 = vector.broadcast %29 : vector<1x1x96xf32> to vector<1x8x96xf32>
    %31 = arith.addf %26, %30 : vector<1x8x96xf32>
    %32 = vector.extract_strided_slice %31 {offsets = [0, 0, 0], sizes = [1, 8, 32], strides = [1, 1, 1]} : vector<1x8x96xf32> to vector<1x8x32xf32>
    %cst_15 = arith.constant 0.353553385 : f32
    %33 = vector.broadcast %cst_15 : f32 to vector<1x8x32xf32>
    %34 = arith.mulf %32, %33 : vector<1x8x32xf32>
    %35 = arith.truncf %34 : vector<1x8x32xf32> to vector<1x8x32xbf16>
    %36 = vector.extract_strided_slice %31 {offsets = [0, 0, 32], sizes = [1, 8, 32], strides = [1, 1, 1]} : vector<1x8x96xf32> to vector<1x8x32xf32>
    %37 = arith.truncf %36 : vector<1x8x32xf32> to vector<1x8x32xbf16>
    %38 = vector.extract_strided_slice %31 {offsets = [0, 0, 64], sizes = [1, 8, 32], strides = [1, 1, 1]} : vector<1x8x96xf32> to vector<1x8x32xf32>
    %39 = arith.truncf %38 : vector<1x8x32xf32> to vector<1x8x32xbf16>
    %40 = vector.shape_cast %35 : vector<1x8x32xbf16> to vector<1x8x4x8xbf16>
    %41 = tpu.transpose %40, [0, 2, 1, 3] : vector<1x8x4x8xbf16> -> vector<1x4x8x8xbf16>
    %42 = vector.shape_cast %41 : vector<1x4x8x8xbf16> to vector<4x8x8xbf16>
    %43 = vector.shape_cast %37 : vector<1x8x32xbf16> to vector<1x8x4x8xbf16>
    %44 = tpu.transpose %43, [0, 2, 1, 3] : vector<1x8x4x8xbf16> -> vector<1x4x8x8xbf16>
    %45 = vector.shape_cast %44 : vector<1x4x8x8xbf16> to vector<4x8x8xbf16>
    %46 = vector.shape_cast %39 : vector<1x8x32xbf16> to vector<1x8x4x8xbf16>
    %47 = tpu.transpose %46, [0, 2, 1, 3] : vector<1x8x4x8xbf16> -> vector<1x4x8x8xbf16>
    %48 = vector.shape_cast %47 : vector<1x4x8x8xbf16> to vector<4x8x8xbf16>
    "tpu.trace_start"() <{level = 10 : i32, message = "bqd,bkd->bqk"}> : () -> ()
    %cst_16 = arith.constant dense<0.000000e+00> : vector<4x8x8xf32>
    %49 = tpu.matmul %42, %45, %cst_16 {dimension_numbers = #tpu.dot_dimension_numbers<[2], [2], [1], [1], [0, 0, 0, 1, 1, 1], [0], [0]>} : vector<4x8x8xbf16>, vector<4x8x8xbf16>, vector<4x8x8xf32> -> vector<4x8x8xf32>
    %cst_17 = arith.constant -1.000000e+30 : f32
    "tpu.trace_stop"() : () -> ()
    %50 = vector.shape_cast %7 : vector<1x8x8xi1> to vector<1x8x8xi1>
    %51 = vector.broadcast %50 : vector<1x8x8xi1> to vector<4x8x8xi1>
    %52 = vector.broadcast %cst_17 : f32 to vector<4x8x8xf32>
    %53 = arith.select %51, %49, %52 : vector<4x8x8xi1>, vector<4x8x8xf32>
    %cst_18 = arith.constant dense<0xFF800000> : vector<4x8xf32>
    %54 = vector.multi_reduction <maximumf>, %53, %cst_18 [2] : vector<4x8x8xf32> to vector<4x8xf32>
    %55 = vector.shape_cast %54 : vector<4x8xf32> to vector<4x8x1xf32>
    %56 = vector.broadcast %55 : vector<4x8x1xf32> to vector<4x8x8xf32>
    %57 = arith.subf %53, %56 : vector<4x8x8xf32>
    %58 = math.exp %57 : vector<4x8x8xf32>
    %cst_19 = arith.constant dense<0.000000e+00> : vector<4x8xf32>
    %59 = vector.multi_reduction <add>, %58, %cst_19 [2] : vector<4x8x8xf32> to vector<4x8xf32>
    %60 = vector.shape_cast %59 : vector<4x8xf32> to vector<4x8x1xf32>
    %61 = tpu.reciprocal %60 {approx = true} : vector<4x8x1xf32> -> vector<4x8x1xf32>
    %62 = vector.broadcast %61 : vector<4x8x1xf32> to vector<4x8x8xf32>
    %63 = arith.mulf %58, %62 : vector<4x8x8xf32>
    %64 = arith.truncf %63 : vector<4x8x8xf32> to vector<4x8x8xbf16>
    "tpu.trace_start"() <{level = 10 : i32, message = "bqk,bkd->bqd"}> : () -> ()
    %cst_20 = arith.constant dense<0.000000e+00> : vector<4x8x8xf32>
    %65 = tpu.matmul %64, %48, %cst_20 {dimension_numbers = #tpu.dot_dimension_numbers<[2], [1], [1], [2], [0, 0, 0, 1, 1, 2], [0], [0]>} : vector<4x8x8xbf16>, vector<4x8x8xbf16>, vector<4x8x8xf32> -> vector<4x8x8xf32>
    "tpu.trace_stop"() : () -> ()
    %66 = vector.shape_cast %65 : vector<4x8x8xf32> to vector<1x4x8x8xf32>
    %67 = tpu.transpose %66, [0, 2, 1, 3] : vector<1x4x8x8xf32> -> vector<1x8x4x8xf32>
    %68 = vector.shape_cast %67 : vector<1x8x4x8xf32> to vector<1x8x32xf32>
    %69 = arith.truncf %68 : vector<1x8x32xf32> to vector<1x8x32xbf16>
    %c0_21 = arith.constant 0 : index
    %c0_22 = arith.constant 0 : index
    %c0_23 = arith.constant 0 : index
    %70 = vector.load %arg7[%c0_21, %c0_22, %c0_23] : memref<1x32x32xbf16, #tpu.memory_space<vmem>>, vector<1x32x32xbf16>
    %71 = vector.shape_cast %70 : vector<1x32x32xbf16> to vector<32x32xbf16>
    %cst_24 = arith.constant dense<0.000000e+00> : vector<1x8x32xf32>
    %72 = tpu.matmul %69, %71, %cst_24 {dimension_numbers = #tpu.dot_dimension_numbers<[2], [0], [0, 1], [1], [0, 0, 0, 1, 1, 1], [], []>} : vector<1x8x32xbf16>, vector<32x32xbf16>, vector<1x8x32xf32> -> vector<1x8x32xf32>
    %c0_25 = arith.constant 0 : index
    %c0_26 = arith.constant 0 : index
    %c0_27 = arith.constant 0 : index
    %73 = vector.load %arg8[%c0_25, %c0_26, %c0_27] : memref<1x1x32xf32, #tpu.memory_space<vmem>>, vector<1x1x32xf32>
    %74 = vector.shape_cast %73 : vector<1x1x32xf32> to vector<1x32xf32>
    %75 = vector.shape_cast %74 : vector<1x32xf32> to vector<1x1x32xf32>
    %76 = vector.broadcast %75 : vector<1x1x32xf32> to vector<1x8x32xf32>
    %77 = arith.addf %72, %76 : vector<1x8x32xf32>
    %78 = arith.addf %3, %77 : vector<1x8x32xf32>
    %c0_28 = arith.constant 0 : index
    %c0_29 = arith.constant 0 : index
    %c0_30 = arith.constant 0 : index
    %79 = vector.load %arg4[%c0_28, %c0_29, %c0_30] : memref<1x1x32xf32, #tpu.memory_space<vmem>>, vector<1x1x32xf32>
    %80 = vector.shape_cast %79 : vector<1x1x32xf32> to vector<1x32xf32>
    %81 = arith.mulf %78, %78 : vector<1x8x32xf32>
    %cst_31 = arith.constant dense<0.000000e+00> : vector<1x8xf32>
    %82 = vector.multi_reduction <add>, %81, %cst_31 [2] : vector<1x8x32xf32> to vector<1x8xf32>
    %83 = vector.shape_cast %82 : vector<1x8xf32> to vector<1x8x1xf32>
    %cst_32 = arith.constant 3.200000e+01 : f32
    %84 = vector.broadcast %cst_32 : f32 to vector<1x8x1xf32>
    %85 = arith.divf %83, %84 : vector<1x8x1xf32>
    %cst_33 = arith.constant 1.1920929E-7 : f32
    %86 = vector.broadcast %cst_33 : f32 to vector<1x8x1xf32>
    %87 = arith.addf %85, %86 : vector<1x8x1xf32>
    %88 = math.rsqrt %87 : vector<1x8x1xf32>
    %89 = vector.broadcast %88 : vector<1x8x1xf32> to vector<1x8x32xf32>
    %90 = arith.mulf %78, %89 : vector<1x8x32xf32>
    %91 = vector.shape_cast %80 : vector<1x32xf32> to vector<1x1x32xf32>
    %92 = vector.broadcast %91 : vector<1x1x32xf32> to vector<1x8x32xf32>
    %93 = arith.mulf %90, %92 : vector<1x8x32xf32>
    %94 = arith.truncf %93 : vector<1x8x32xf32> to vector<1x8x32xbf16>
    %c0_34 = arith.constant 0 : index
    %c0_35 = arith.constant 0 : index
    %c0_36 = arith.constant 0 : index
    %95 = vector.load %arg9[%c0_34, %c0_35, %c0_36] : memref<1x32x128xbf16, #tpu.memory_space<vmem>>, vector<1x32x128xbf16>
    %96 = vector.shape_cast %95 : vector<1x32x128xbf16> to vector<32x128xbf16>
    %cst_37 = arith.constant dense<0.000000e+00> : vector<1x8x128xf32>
    %97 = tpu.matmul %94, %96, %cst_37 {dimension_numbers = #tpu.dot_dimension_numbers<[2], [0], [0, 1], [1], [0, 0, 0, 1, 1, 1], [], []>} : vector<1x8x32xbf16>, vector<32x128xbf16>, vector<1x8x128xf32> -> vector<1x8x128xf32>
    %c0_38 = arith.constant 0 : index
    %c0_39 = arith.constant 0 : index
    %c0_40 = arith.constant 0 : index
    %98 = vector.load %arg10[%c0_38, %c0_39, %c0_40] : memref<1x32x128xbf16, #tpu.memory_space<vmem>>, vector<1x32x128xbf16>
    %99 = vector.shape_cast %98 : vector<1x32x128xbf16> to vector<32x128xbf16>
    %cst_41 = arith.constant dense<0.000000e+00> : vector<1x8x128xf32>
    %100 = tpu.matmul %94, %99, %cst_41 {dimension_numbers = #tpu.dot_dimension_numbers<[2], [0], [0, 1], [1], [0, 0, 0, 1, 1, 1], [], []>} : vector<1x8x32xbf16>, vector<32x128xbf16>, vector<1x8x128xf32> -> vector<1x8x128xf32>
    %cst_42 = arith.constant 0.000000e+00 : f32
    %101 = vector.broadcast %cst_42 : f32 to vector<1x8x128xf32>
    %102 = arith.subf %101, %97 : vector<1x8x128xf32>
    %103 = math.exp %102 : vector<1x8x128xf32>
    %cst_43 = arith.constant 1.000000e+00 : f32
    %104 = vector.broadcast %cst_43 : f32 to vector<1x8x128xf32>
    %105 = arith.addf %104, %103 : vector<1x8x128xf32>
    %cst_44 = arith.constant 1.000000e+00 : f32
    %106 = vector.broadcast %cst_44 : f32 to vector<1x8x128xf32>
    %107 = arith.divf %106, %105 : vector<1x8x128xf32>
    %108 = arith.mulf %97, %107 : vector<1x8x128xf32>
    %109 = arith.mulf %108, %100 : vector<1x8x128xf32>
    %110 = arith.truncf %109 : vector<1x8x128xf32> to vector<1x8x128xbf16>
    %c0_45 = arith.constant 0 : index
    %c0_46 = arith.constant 0 : index
    %c0_47 = arith.constant 0 : index
    %111 = vector.load %arg11[%c0_45, %c0_46, %c0_47] : memref<1x128x32xbf16, #tpu.memory_space<vmem>>, vector<1x128x32xbf16>
    %112 = vector.shape_cast %111 : vector<1x128x32xbf16> to vector<128x32xbf16>
    %cst_48 = arith.constant dense<0.000000e+00> : vector<1x8x32xf32>
    %113 = tpu.matmul %110, %112, %cst_48 {dimension_numbers = #tpu.dot_dimension_numbers<[2], [0], [0, 1], [1], [0, 0, 0, 1, 1, 1], [], []>} : vector<1x8x128xbf16>, vector<128x32xbf16>, vector<1x8x32xf32> -> vector<1x8x32xf32>
    %114 = arith.addf %78, %113 : vector<1x8x32xf32>
    %c0_49 = arith.constant 0 : index
    %c0_50 = arith.constant 0 : index
    %c0_51 = arith.constant 0 : index
    %115 = vector.load %arg12[%c0_49, %c0_50, %c0_51] : memref<1x8x32xf32, #tpu.memory_space<vmem>>, vector<1x8x32xf32>
    tpu.vector_store %arg12[%c0_49, %c0_50, %c0_51], %114 {strides = array<i32>} : memref<1x8x32xf32, #tpu.memory_space<vmem>>, vector<1x8x32xf32>,
    return
  }
  func.func @transform_0(%arg0: i32, %arg1: i32) -> (i32, i32, i32) {
    %c0_i32 = arith.constant 0 : i32
    %c0_i32_0 = arith.constant 0 : i32
    %c0_i32_1 = arith.constant 0 : i32
    return %arg0, %c0_i32, %c0_i32_0 : i32, i32, i32
  }
  func.func @transform_1(%arg0: i32, %arg1: i32) -> (i32, i32, i32) {
    %c0_i32 = arith.constant 0 : i32
    %c0_i32_0 = arith.constant 0 : i32
    %c0_i32_1 = arith.constant 0 : i32
    return %arg1, %c0_i32, %c0_i32_0 : i32, i32, i32
  }
  func.func @transform_2(%arg0: i32, %arg1: i32) -> (i32, i32, i32) {
    %c0_i32 = arith.constant 0 : i32
    %c0_i32_0 = arith.constant 0 : i32
    %c0_i32_1 = arith.constant 0 : i32
    return %arg1, %c0_i32, %c0_i32_0 : i32, i32, i32
  }
  func.func @transform_3(%arg0: i32, %arg1: i32) -> (i32, i32, i32) {
    %c0_i32 = arith.constant 0 : i32
    %c0_i32_0 = arith.constant 0 : i32
    %c0_i32_1 = arith.constant 0 : i32
    return %arg1, %c0_i32, %c0_i32_0 : i32, i32, i32
  }
  func.func @transform_4(%arg0: i32, %arg1: i32) -> (i32, i32, i32) {
    %c0_i32 = arith.constant 0 : i32
    %c0_i32_0 = arith.constant 0 : i32
    %c0_i32_1 = arith.constant 0 : i32
    return %arg1, %c0_i32, %c0_i32_0 : i32, i32, i32
  }
  func.func @transform_5(%arg0: i32, %arg1: i32) -> (i32, i32, i32) {
    %c0_i32 = arith.constant 0 : i32
    %c0_i32_0 = arith.constant 0 : i32
    %c0_i32_1 = arith.constant 0 : i32
    return %arg1, %c0_i32, %c0_i32_0 : i32, i32, i32
  }
  func.func @transform_6(%arg0: i32, %arg1: i32) -> (i32, i32, i32) {
    %c0_i32 = arith.constant 0 : i32
    %c0_i32_0 = arith.constant 0 : i32
    %c0_i32_1 = arith.constant 0 : i32
    return %arg1, %c0_i32, %c0_i32_0 : i32, i32, i32
  }
  func.func @transform_7(%arg0: i32, %arg1: i32) -> (i32, i32, i32) {
    %c0_i32 = arith.constant 0 : i32
    %c0_i32_0 = arith.constant 0 : i32
    %c0_i32_1 = arith.constant 0 : i32
    return %arg1, %c0_i32, %c0_i32_0 : i32, i32, i32
  }
  func.func @transform_8(%arg0: i32, %arg1: i32) -> (i32, i32, i32) {
    %c0_i32 = arith.constant 0 : i32
    %c0_i32_0 = arith.constant 0 : i32
    %c0_i32_1 = arith.constant 0 : i32
    return %arg1, %c0_i32, %c0_i32_0 : i32, i32, i32
  }
  func.func @transform_9(%arg0: i32, %arg1: i32) -> (i32, i32, i32) {
    %c0_i32 = arith.constant 0 : i32
    %c0_i32_0 = arith.constant 0 : i32
    %c0_i32_1 = arith.constant 0 : i32
    return %arg1, %c0_i32, %c0_i32_0 : i32, i32, i32
  }
  func.func @transform_10(%arg0: i32, %arg1: i32) -> (i32, i32, i32) {
    %c0_i32 = arith.constant 0 : i32
    %c0_i32_0 = arith.constant 0 : i32
    %c0_i32_1 = arith.constant 0 : i32
    return %arg0, %c0_i32, %c0_i32_0 : i32, i32, i32
  }
}

</mosaic_0001>

<bundles_post_ra>
// kernel: tpu_custom_call.1
= control target key start
LH: loop header
LB: loop body
LE: loop exit
PB: predicated region body
PF: predicated region fallthrough
CT: control target
= control target key end

     0   :  { %s3142_s0 = inlined_call_operand.vmem [shape: f32[2,8,32], index: 0, kind: input, shape index: {}]   ;;  %s3143_s1 = inlined_call_operand.vmem [shape: f32[2,1,32], index: 1, kind: input, shape index: {}]   ;;  %s3144_s2 = inlined_call_operand.vmem [shape: f32[2,1,32], index: 2, kind: input, shape index: {}]   ;;  %s3145_s3 = inlined_call_operand.vmem [shape: bf16[2,32,96], index: 3, kind: input, shape index: {}]   ;;  %s3146_s4 = inlined_call_operand.vmem [shape: f32[2,1,96], index: 4, kind: input, shape index: {}]   ;;  %s3147_s5 = inlined_call_operand.vmem [shape: bf16[2,32,32], index: 5, kind: input, shape index: {}]   ;;  %s3148_s6 = inlined_call_operand.vmem [shape: f32[2,1,32], index: 6, kind: input, shape index: {}]   ;;  %s3149_s7 = inlined_call_operand.vmem [shape: bf16[2,32,128], index: 7, kind: input, shape index: {}]   ;;  %s3150_s8 = inlined_call_operand.vmem [shape: bf16[2,32,128], index: 8, kind: input, shape index: {}]   ;;  %s3151_s9 = inlined_call_operand.vmem [shape: bf16[2,128,32], index: 9, kind: input, shape index: {}]   ;;  %s3152_s10 = inlined_call_operand.hbm [shape: f32[2,8,32], index: 10, kind: output, shape index: {}]  }
   0x1   :  { %3167 = sst [smem:[#allocation17_spill]] %s3152_s10 }
   0x2   :  { %15 = vsyncpa [#allocation3], 0 }
   0x3   :  { %17 = vsyncpa [#allocation3 + $0x1], 0  ;;  %s2697_s13 = smov 0   ;;  %s2699_s14 = smov 0  }
   0x4   :  { %s2701_s15 = smov 0   ;;  %s2703_s16 = smov 0  }
   0x5   :  { %s2705_s17 = smov 0   ;;  %s2707_s18 = smov 0  }
   0x6   :  { %s2709_s19 = smov 0   ;;  %s2711_s20 = smov 0  }
   0x7 LB: > { %3168 = sst [smem:[#allocation5_spill]] %s2598_s13  ;;  %s2212_s21 = sadd.s32 4294967295, %s2626_s20   ;;  %s2626_s20 = sphi %s2711_s20, %s23_s20   ;;  %s2622_s19 = sphi %s2709_s19, %s3200_s19   ;;  %s2618_s18 = sphi %s2707_s18, %s3199_s18   ;;  %s2614_s17 = sphi %s2705_s17, %s3198_s17   ;;  %s2610_s16 = sphi %s2703_s16, %s3197_s16   ;;  %s2606_s15 = sphi %s2701_s15, %s3196_s15   ;;  %s2602_s14 = sphi %s2699_s14, %s3195_s14   ;;  %s2598_s13 = sphi %s2697_s13, %s3194_s13  }
   0x8   : > { %3169 = sst [smem:[#allocation6_spill]] %s2602_s14  ;;  %s2213_s22 = sadd.s32 4294967294, %s2626_s20  }
   0x9   : > { %3170 = sst [smem:[#allocation7_spill]] %s2606_s15  ;;  %s32_s23 = sadd.s32 1, %s2618_s18 }
   0xa   : > { %3171 = sst [smem:[#allocation8_spill]] %s2614_s17  ;;  %p33_p0 = scmp.ge.s32.totalorder %s32_s23, 2 }
   0xb   : > { %3172 = sst [smem:[#allocation9_spill]] %s2618_s18  ;;  %s35_s24 = sadd.s32 1, %s2622_s19 }
   0xc   : > { %3173 = sst [smem:[#allocation10_spill]] %s2622_s19  ;;  %p312_p1 = scmp.ne.s32.totalorder %s2606_s15, %s2602_s14 }
   0xd   : > { %3174 = sst [smem:[#allocation11_spill]] %s2626_s20  ;;  %p313_p2 = scmp.eq.s32.totalorder %s2212_s21, 3 }
   0xe   : > { %s3202_s23 = smov (%p33_p0, %s32_s23), 0  ;;  %s3204_s24 = smov (!%p33_p0, %s35_s24), %s2622_s19 }
   0xf   : > { %3175 = sst [smem:[#allocation12_spill]] %s3202_s23  ;;  %p2746_p3 = por %p313_p2, %p312_p1 }
  0x10   : > { %p318_p4 = scmp.ne.s32.totalorder %s2602_s14, %s2598_s13  ;;  %p37_p5 = scmp.ge.s32.totalorder %s3204_s24, 2 }
  0x11   : > { %s3176_s25 = scalar_select %p2746_p3, 1, 0 }
  0x12   : > { %p319_p6 = scmp.eq.s32.totalorder %s2213_s22, 3  ;;  %p2216_p7 = scmp.ge.s32.totalorder %s2626_s20, 1 }
  0x13   : > { %3177 = sst [smem:[#allocation13_spill]] %s3176_s25  ;;  %p408_p8 = scmp.lt.s32.totalorder %s2626_s20, 5 }
  0x14   : > { %s3206_s24 = smov (%p37_p5, %s3204_s24), 0  ;;  %p2756_p9 = por %p319_p6, %p318_p4 }
  0x15   : > { %3178 = sst [smem:[#allocation14_spill]] %s3206_s24  ;;  %p409_p10 = pnand %p2216_p7, %p408_p8 }
  0x16   : > { %s3179_s26 = scalar_select %p2756_p9, 1, 0 }
  0x17   : > { %s299_s27 = ssub.s32 %s2622_s19, %s3206_s24  ;;  %s302_s28 = sadd.s32 1, %s2606_s15 }
  0x18   : > { %3180 = sst [smem:[#allocation15_spill]] %s3179_s26  ;;  %p300_p11 = scmp.eq.s32.totalorder %s299_s27, 0 }
  0x19   : > { %412 = sbr.rel (%p409_p10) target bundleno = 2389 (0x955), region = 60  ;;  %s3156_s30 = sand.u32 (!%p409_p10), 1, %s2602_s14  }
  0x1a   : > { %s2764_s29 = scalar_select %p300_p11, %s2606_s15, %s302_s28  }
  0x1b   : > { %p482_p12 = scmp.lt.s32.totalorder (!%p409_p10), %s2614_s17, 1  ;;  %s2217_s11 = sshll.u32 (!%p409_p10), %s3156_s30, 3 }
  0x1c   : > { %3181 = sst [smem:[#allocation16_spill]] %s2764_s29  ;;  %p486_p13 = scmp.lt.s32.totalorder (!%p409_p10), %s2610_s16, 1 }
  0x1d   : > { %s2819_s27 = scalar_lea.vmem (!%p409_p10), [#allocation2], %s2217_s11  ;;  %p2229_p0 = scmp.ne.s32.totalorder (!%p409_p10), %s2610_s16, 0 }
  0x1e   : > { %s483_s12 = scalar_select %p482_p12, %s2614_s17, 1 }
  0x1f   : > { %s2773_s21 = scalar_select %p486_p13, %s2610_s16, 1 }
  0x20   : > { %s2218_s22 = sshll.u32 %s483_s12, 3 }
  0x21   : > { %s485_s24 = scalar_lea.vmem %s3142_s0, %s2218_s22  ;;  %s2268_s26 = sshll.u32 %s2773_s21, 4 }
  0x22   : > { %s496_s10 = scalar_lea.vmem %s3145_s3, %s2268_s26  ;;  %s2797_s22 = scalar_lea.vmem %s3147_s5, %s2268_s26 }
  0x23   : > { %s507_s28 = scalar_lea.vmem %s3148_s6, %s2773_s21  ;;  %s2806_s15 = scalar_lea.vmem %s3149_s7, %s2268_s26 }
  0x24   : > { %s2811_s18 = scalar_lea.vmem %s3150_s8, %s2268_s26  ;;  %s2272_s14 = sshll.u32 %s2773_s21, 6 }
  0x25   : > { %s2817_s17 = scalar_lea.vmem %s3151_s9, %s2272_s14  ;;  %527 = sbr.rel (%p2229_p0) target bundleno = 44 (0x2c), region = 64 }
  0x2a   : > { %v528_v0 = vld [vmem:[%s485_s24] sm:$0xff]  ;;  %vm529_vm0 = vcmask 261120  }
  0x2b   : > { %530 = vst.msk [vmem:[%s2819_s27] sm:$0xff] %vm529_vm0, %v528_v0 }
  0x2c PF: > { %vm539_vm1 = vcmask 261120   ;;  %v2494_v4 = vld [vmem:[%s496_s10 + $0x8] sm:$0xff]   ;;  %v2628_v5 = vmov 0.0   ;;  %vm2629_vm2 = vmmov 0   ;;  %v2495_v6 = vld [vmem:[%s496_s10] sm:$0xff]   ;;  %s3182_s10 = scalar_lea.vmem %s3143_s1, %s2773_s21  ;;  %s3183_s12 = scalar_lea.vmem %s3146_s4, %s2773_s21  ;;  %v532_v27 = vlaneseq }
  0x2d   : > { %2310 = vmatprep.subr.bf16.mxu1 %v2628_v5  ;;  %2314 = vmatprep.mubr.msk.bf16.mxu1 %vm2629_vm2, %v2628_v5  ;;  %v2230_v11 = vld [vmem:[%s3182_s10] ss:$0 sm:$0xff]  ;;  %s2630_s19 = smov 112   ;;  %s2631_s23 = smov 120   ;;  %v2634_v28 = vmov 1983009808  }
  0x2e   : > { %2311 = vmatpush3.bf16.msra.mxu1 %v2494_v4  ;;  %2336 = vmatprep.subr.bf16.mxu0 %v2628_v5  ;;  %v2231_v15 = vld [vmem:[%s3183_s12] ss:$0 sm:$0xff]  ;;  %s2632_s29 = smov 104   ;;  %s2633_s30 = smov 96   ;;  %v633_v29 = vunpack.c.l.s4 %v2634_v28  ;;  %v2867_v30 = vshrl.u32 %v532_v27, 7  ;;  %v2636_v56 = vmov 0  }
  0x2f   : > { %2312 = vmatprep.subr.bf16.mxu1 %v2628_v5  ;;  %2338 = vmatprep.mubr.msk.bf16.mxu0 %vm2629_vm2, %v2628_v5  ;;  %v2635_v33 = vmov 1934713408   ;;  %vm1140_vm3 = vcmask 64512   ;;  %s2637_s13 = smov 64   ;;  %vm1382_vm5 = vcmask 1043456   ;;  %s2639_s20 = smov 8  }
  0x30   : > { %v634_v31 = vunpack.c.0.s8 %v633_v29  ;;  %v650_v34 = vunpack.c.l.s4 %v2635_v33  ;;  %s2640_s14 = smov 24   ;;  %vm1713_vm6 = vcmask 130048   ;;  %vm1715_vm7 = vcmask 195584   ;;  %s2046_s26 = sshll.u32 %s2819_s27, 4  ;;  %s3088_s26 = int_to_ptr.vmem [resolvable:$true] %s2046_s26 }
  0x32   : > { %v2824_v1 = vld [vmem:[%s2819_s27] sm:$0xff]  ;;  %2313 = vmatpush3.bf16.msra.mxu1 %v2495_v6  ;;  %v2870_v36 = vsub.s32 %v634_v31, %v2867_v30  ;;  %v651_v38 = vunpack.c.0.s8 %v650_v34 }
  0x33   : > { %v538_v2 = vmul.f32 %v2824_v1, %v2824_v1  ;;  %2318 = vmatprep.subr.bf16.mxu1 %v2628_v5 }
  0x34   : > { %v2877_v44 = vsub.s32 %v651_v38, %v2867_v30 }
  0x35   : > { %v540_v3 = vsel %vm539_vm1, %v538_v2, 0.0 }
  0x36   : > { %541 = vadd.xlane.f32.xlu0 %v540_v3 }
  0xbf   : > { %v542_v7 = vpop.xlane.xlu0 %541 }
  0xc0   : > { %v544_v8 = vmul.f32 0.03125, %v542_v7 }
  0xc2   : > { %v545_v9 = vadd.f32 1.1920929e-07, %v544_v8 }
  0xc4   : > { %2510 = vrsqrt.f32 %v545_v9 }
  0xd1   : > { %v2511_v10 = vpop.eup %2510 }
  0xd2   : > { %v547_v12 = vmul.f32 %v2511_v10, %v2824_v1 }
  0xd4   : > { %v554_v13 = vmul.f32 %v2230_v11, %v547_v12 }
  0xd6   : > { %v555_v14 = vpack.c.bf16 %v554_v13, %v554_v13 }
  0xd8   : > { %2315 = vmatmul.mubr.msk.bf16.vlgmr.msra.gmra.mxu1 %vm539_vm1, %v555_v14 }
  0xd9   : > { %2320 = vmatprep.mubr.msk.bf16.mxu1 %vm2629_vm2, %v2628_v5 }
 0x198   : > { %v616_v16 = vpop.f32.mrf.mxu1 }
 0x199   : > { %v617_v17 = vadd.f32 %v2231_v15, %v616_v16 }
 0x19a   : > { %v2316_v18 = vpop.f32.mrf.mxu1 }
 0x19b   : > { %v622_v19 = vmul.f32 0.35355338, %v617_v17  ;;  %v2851_v20 = vpack.c.bf16 %v617_v17, %v617_v17 }
 0x19c   : > { %v619_v21 = vpop.f32.mrf.mxu1 }
 0x19d   : > { %796 = vrot.lane.b32.xlu1 %v2851_v20, %s2630_s19  ;;  %794 = vrot.lane.b32.xlu0 %v2851_v20, %s2631_s23  ;;  %v623_v23 = vpack.c.bf16 %v622_v19, %v622_v19 }
 0x19e   : > { %v2317_v22 = vpop.f32.mrf.mxu1 }
 0x19f   : > { %v638_v40 = vrot.slane %v623_v23, %v2870_v36 }
 0x1a1   : > { %798 = vrot.lane.b32.xlu1 %v2851_v20, %s2632_s29  ;;  %628 = vrot.lane.b32.xlu0 %v623_v23, %s2630_s19  ;;  %s3188_s19 = sld [smem:[#allocation17_spill]] }
 0x1a5   : > { %800 = vrot.lane.b32.xlu1 %v2851_v20, %s2633_s30 }
 0x20f   : > { %v2857_v24 = vpop.permute.xlu0 %794  ;;  %v2860_v25 = vpop.permute.xlu1 %796 }
 0x210   : > { %802 = vrot.lane.b32.xlu1 %v2857_v24, %s2633_s30 }
 0x213   : > { %v2863_v26 = vpop.permute.xlu1 %798  ;;  %v629_v35 = vpop.permute.xlu0 %628 }
 0x214   : > { %804 = vrot.lane.b32.xlu1 %v2860_v25, %s2633_s30  ;;  %v646_v39 = vrot.slane %v629_v35, %v2870_v36 }
 0x216   : > { %v647_v45 = vcombine.low %v638_v40, %v646_v39  ;;  %v648_v46 = vcombine.high %v638_v40, %v646_v39 }
 0x217   : > { %v801_v32 = vpop.permute.xlu1 %800 }
 0x218   : > { %806 = vrot.lane.b32.xlu1 %v2863_v26, %s2633_s30  ;;  %v815_v42 = vrot.slane %v801_v32, %v2870_v36  ;;  %v655_v53 = vrot.slane %v647_v45, %v2877_v44  ;;  %v662_v54 = vrot.slane %v648_v46, %v2877_v44 }
 0x21a   : > { %v663_v62 = vcombine.high %v655_v53, %v2636_v56  ;;  %v664_v63 = vcombine.high %v662_v54, %v2636_v56  ;;  %v703_v31 = vshrl.u32 %v655_v53, 16 }
 0x21c   : > { %626 = vrot.lane.b32.xlu1 %v623_v23, %s2631_s23  ;;  %v711_v35 = vshrl.u32 %v663_v62, 16  ;;  %s3189_s23 = smov %s3188_s19 }
 0x220   : > { %630 = vrot.lane.b32.xlu1 %v623_v23, %s2632_s29 }
 0x282   : > { %v803_v37 = vpop.permute.xlu1 %802 }
 0x283   : > { %v849_v55 = vrot.slane %v803_v37, %v2870_v36  ;;  %v719_v37 = vshrl.u32 %v662_v54, 16 }
 0x286   : > { %v805_v41 = vpop.permute.xlu1 %804 }
 0x287   : > { %v823_v43 = vrot.slane %v805_v41, %v2870_v36 }
 0x289   : > { %v824_v47 = vcombine.low %v815_v42, %v823_v43  ;;  %v825_v48 = vcombine.high %v815_v42, %v823_v43 }
 0x28a   : > { %v807_v49 = vpop.permute.xlu1 %806 }
 0x28b   : > { %v832_v50 = vrot.slane %v824_v47, %v2877_v44  ;;  %v839_v51 = vrot.slane %v825_v48, %v2877_v44  ;;  %v857_v52 = vrot.slane %v807_v49, %v2870_v36 }
 0x28d   : > { %v840_v57 = vcombine.high %v832_v50, %v2636_v56  ;;  %v841_v58 = vcombine.high %v839_v51, %v2636_v56  ;;  %v858_v59 = vcombine.low %v849_v55, %v857_v52  ;;  %v859_v60 = vcombine.high %v849_v55, %v857_v52 }
 0x28e   : > { %v627_v61 = vpop.permute.xlu1 %626  ;;  %v880_v3 = vshrl.u32 %v832_v50, 16  ;;  %v896_v6 = vshrl.u32 %v839_v51, 16  ;;  %v727_v55 = vshrl.u32 %v664_v63, 16 }
 0x28f   : > { %v866_v0 = vrot.slane %v858_v59, %v2877_v44  ;;  %v873_v2 = vrot.slane %v859_v60, %v2877_v44  ;;  %v888_v4 = vshrl.u32 %v840_v57, 16  ;;  %v904_v7 = vshrl.u32 %v841_v58, 16 }
 0x290   : > { %v672_v15 = vrot.slane %v627_v61, %v2870_v36 }
 0x291   : > { %v874_v8 = vcombine.high %v866_v0, %v2636_v56  ;;  %v875_v9 = vcombine.high %v873_v2, %v2636_v56  ;;  %v878_v10 = vpack.i.b16 %v866_v0, %v832_v50  ;;  %v881_v11 = vshrl.u32 %v866_v0, 16 }
 0x292   : > { %v631_v12 = vpop.permute.xlu1 %630  ;;  %v894_v13 = vpack.i.b16 %v873_v2, %v839_v51  ;;  %v897_v14 = vshrl.u32 %v873_v2, 16 }
 0x293   : > { %v680_v16 = vrot.slane %v631_v12, %v2870_v36  ;;  %v882_v17 = vpack.i.b16 %v881_v11, %v880_v3  ;;  %v886_v18 = vpack.i.b16 %v874_v8, %v840_v57  ;;  %v889_v19 = vshrl.u32 %v874_v8, 16 }
 0x294   : > { %v902_v21 = vpack.i.b16 %v875_v9, %v841_v58  ;;  %v898_v22 = vpack.i.b16 %v897_v14, %v896_v6  ;;  %v905_v23 = vshrl.u32 %v875_v9, 16  ;;  %v908_v28 = vcombine.low %v878_v10, %v894_v13 }
 0x295   : > { %v681_v29 = vcombine.low %v672_v15, %v680_v16  ;;  %v890_v32 = vpack.i.b16 %v889_v19, %v888_v4  ;;  %v682_v34 = vcombine.high %v672_v15, %v680_v16 }
 0x296   : > { %v916_v33 = vcombine.low %v886_v18, %v902_v21  ;;  %v906_v38 = vpack.i.b16 %v905_v23, %v904_v7  ;;  %v915_v40 = vrot.slane %v908_v28, %v2870_v36  ;;  %v933_v41 = vcombine.low %v882_v17, %v898_v22 }
 0x297   : > { %v689_v39 = vrot.slane %v681_v29, %v2877_v44  ;;  %v696_v42 = vrot.slane %v682_v34, %v2877_v44 }
 0x298   : > { %v923_v43 = vrot.slane %v916_v33, %v2870_v36  ;;  %v941_v45 = vcombine.low %v890_v32, %v906_v38  ;;  %v940_v6 = vrot.slane %v933_v41, %v2870_v36 }
 0x299   : > { %v697_v46 = vcombine.high %v689_v39, %v2636_v56  ;;  %v701_v47 = vpack.i.b16 %v689_v39, %v655_v53  ;;  %v704_v48 = vshrl.u32 %v689_v39, 16  ;;  %v698_v49 = vcombine.high %v696_v42, %v2636_v56 }
 0x29a   : > { %v717_v50 = vpack.i.b16 %v696_v42, %v662_v54  ;;  %v720_v51 = vshrl.u32 %v696_v42, 16  ;;  %v924_v52 = vcombine.low %v915_v40, %v923_v43  ;;  %v948_v53 = vrot.slane %v941_v45, %v2870_v36 }
 0x29b   : > { %v705_v57 = vpack.i.b16 %v704_v48, %v703_v31  ;;  %v709_v58 = vpack.i.b16 %v697_v46, %v663_v62  ;;  %v712_v59 = vshrl.u32 %v697_v46, 16  ;;  %v725_v61 = vpack.i.b16 %v698_v49, %v664_v63 }
 0x29c   : > { %v721_v60 = vpack.i.b16 %v720_v51, %v719_v37  ;;  %v728_v0 = vshrl.u32 %v698_v49, 16  ;;  %v731_v2 = vcombine.low %v701_v47, %v717_v50  ;;  %v931_v4 = vrot.slane %v924_v52, %v2877_v44 }
 0x29d   : > { %v713_v3 = vpack.i.b16 %v712_v59, %v711_v35  ;;  %v739_v8 = vcombine.low %v709_v58, %v725_v61  ;;  %v949_v9 = vcombine.low %v940_v6, %v948_v53  ;;  %v535_v50 = vand.u32 127, %v532_v27 }
 0x29e   : > { %v729_v7 = vpack.i.b16 %v728_v0, %v727_v55  ;;  %v756_v54 = vcombine.low %v705_v57, %v721_v60  ;;  %v738_v10 = vrot.slane %v731_v2, %v2870_v36  ;;  %v932_v12 = vcombine.high %v931_v4, %v2636_v56 }
 0x29f   : > { %v746_v62 = vrot.slane %v739_v8, %v2870_v36  ;;  %v956_v63 = vrot.slane %v949_v9, %v2877_v44  ;;  %v961_v32 = vshrl.u32 %v931_v4, 16  ;;  %vm536_vm4 = vcmp.le.s32.totalorder %v535_v50, %v2867_v30 }
 0x2a0   : > { %v764_v11 = vcombine.low %v713_v3, %v729_v7  ;;  %v763_v14 = vrot.slane %v756_v54, %v2870_v36  ;;  %v967_v22 = vshrl.u32 %v932_v12, 16 }
 0x2a1   : > { %v747_v13 = vcombine.low %v738_v10, %v746_v62  ;;  %v960_v16 = vpack.i.b16 %v956_v63, %v931_v4  ;;  %v957_v17 = vcombine.high %v956_v63, %v2636_v56  ;;  %v962_v28 = vshrl.u32 %v956_v63, 16 }
 0x2a2   : > { %v771_v15 = vrot.slane %v764_v11, %v2870_v36 }
 0x2a3   : > { %v754_v19 = vrot.slane %v747_v13, %v2877_v44  ;;  %v1145_v21 = vsel %vm1140_vm3, %v960_v16, 0  ;;  %v968_v23 = vshrl.u32 %v957_v17, 16  ;;  %v963_v38 = vpack.i.b16 %v962_v28, %v961_v32 }
 0x2a4   : > { %v772_v18 = vcombine.low %v763_v14, %v771_v15  ;;  %2319 = vmatpush3.bf16.xpose.msra.mxu1 %v1145_v21  ;;  %v966_v46 = vpack.i.b16 %v957_v17, %v932_v12 }
 0x2a5   : > { %v969_v31 = vpack.i.b16 %v968_v23, %v967_v22  ;;  %2324 = vmatprep.subr.bf16.mxu1 %v2628_v5  ;;  %v755_v33 = vcombine.high %v754_v19, %v2636_v56  ;;  %v1191_v41 = vsel %vm1140_vm3, %v963_v38, 0  ;;  %v784_v45 = vshrl.u32 %v754_v19, 16 }
 0x2a6   : > { %v779_v29 = vrot.slane %v772_v18, %v2877_v44  ;;  %v1237_v48 = vsel %vm1140_vm3, %v966_v46, 0 }
 0x2a7   : > { %v1283_v35 = vsel %vm1140_vm3, %v969_v31, 0  ;;  %v790_v40 = vshrl.u32 %v755_v33, 16 }
 0x2a8   : > { %v780_v34 = vcombine.high %v779_v29, %v2636_v56  ;;  %v783_v37 = vpack.i.b16 %v779_v29, %v754_v19  ;;  %2337 = vmatpush3.bf16.xpose.msra.mxu0 %v1283_v35  ;;  %v785_v43 = vshrl.u32 %v779_v29, 16 }
 0x2a9   : > { %2348 = vmatprep.subr.bf16.mxu0 %v2628_v5 }
 0x2aa   : > { %v791_v39 = vshrl.u32 %v780_v34, 16  ;;  %v786_v47 = vpack.i.b16 %v785_v43, %v784_v45  ;;  %v789_v49 = vpack.i.b16 %v780_v34, %v755_v33 }
 0x2ab   : > { %2321 = vmatmul.mubr.msk.bf16.vlgmr.msra.gmra.mxu1 %vm1140_vm3, %v783_v37 }
 0x2ac   : > { %v792_v42 = vpack.i.b16 %v791_v39, %v790_v40  ;;  %2325 = vmatpush3.bf16.xpose.msra.mxu1 %v1191_v41  ;;  %2326 = vmatprep.mubr.msk.bf16.mxu1 %vm2629_vm2, %v2628_v5 }
 0x2ad   : > { %2330 = vmatprep.subr.bf16.mxu1 %v2628_v5 }
 0x2af   : > { %2339 = vmatmul.mubr.msk.bf16.vlgmr.msra.gmra.mxu0 %vm1140_vm3, %v792_v42 }
 0x2b0   : > { %2350 = vmatprep.mubr.msk.bf16.mxu0 %vm2629_vm2, %v2628_v5 }
 0x2b3   : > { %2327 = vmatmul.mubr.msk.bf16.vlgmr.msra.gmra.mxu1 %vm1140_vm3, %v786_v47 }
 0x2b4   : > { %2331 = vmatpush3.bf16.xpose.msra.mxu1 %v1237_v48  ;;  %2332 = vmatprep.mubr.msk.bf16.mxu1 %vm2629_vm2, %v2628_v5 }
 0x2b5   : > { %2342 = vmatprep.subr.bf16.mxu1 %v2628_v5 }
 0x2bb   : > { %2333 = vmatmul.mubr.msk.bf16.vlgmr.msra.gmra.mxu1 %vm1140_vm3, %v789_v49 }
 0x2bc   : > { %2344 = vmatprep.mubr.msk.bf16.mxu1 %vm2629_vm2, %v2628_v5 }
 0x36b   : > { %v1181_v51 = vpop.f32.mrf.mxu1 }
 0x36c   : > { %v1327_v52 = vsel %vm536_vm4, %v1181_v51, -1e+30 }
 0x36d   : > { %v2322_v55 = vpop.f32.mrf.mxu1  ;;  %v1331_v57 = vsel %vm1140_vm3, %v1327_v52, -inf }
 0x36e   : > { %1332 = vmax.xlane.f32.xlu0 %v1331_v57 }
 0x36f   : > { %v1184_v58 = vpop.f32.mrf.mxu1  ;;  %v1319_v59 = vpop.f32.mrf.mxu0 }
 0x370   : > { %v1330_v62 = vsel %vm536_vm4, %v1319_v59, -1e+30 }
 0x371   : > { %v2323_v60 = vpop.f32.mrf.mxu1  ;;  %v2340_v61 = vpop.f32.mrf.mxu0  ;;  %v1340_v12 = vsel %vm1140_vm3, %v1330_v62, -inf }
 0x373   : > { %v1227_v0 = vpop.f32.mrf.mxu1  ;;  %v1322_v2 = vpop.f32.mrf.mxu0 }
 0x374   : > { %v1328_v3 = vsel %vm536_vm4, %v1227_v0, -1e+30 }
 0x375   : > { %v2328_v27 = vpop.f32.mrf.mxu1  ;;  %v2341_v4 = vpop.f32.mrf.mxu0  ;;  %v1334_v6 = vsel %vm1140_vm3, %v1328_v3, -inf }
 0x376   : > { %1335 = vmax.xlane.f32.xlu1 %v1334_v6 }
 0x377   : > { %v1230_v53 = vpop.f32.mrf.mxu1 }
 0x379   : > { %v2329_v7 = vpop.f32.mrf.mxu1 }
 0x37b   : > { %v1273_v8 = vpop.f32.mrf.mxu1 }
 0x37c   : > { %v1329_v54 = vsel %vm536_vm4, %v1273_v8, -1e+30 }
 0x37d   : > { %v2334_v9 = vpop.f32.mrf.mxu1  ;;  %v1337_v10 = vsel %vm1140_vm3, %v1329_v54, -inf }
 0x37e   : > { %1338 = vmax.xlane.f32.xlu0 %v1337_v10 }
 0x37f   : > { %v1276_v11 = vpop.f32.mrf.mxu1 }
 0x381   : > { %v2335_v63 = vpop.f32.mrf.mxu1 }
 0x382   : > { %1341 = vmax.xlane.f32.xlu0 %v1340_v12 }
 0x387   : > { %970 = vrot.lane.b32.xlu1 %v2851_v20, %s2637_s13 }
 0x3f7   : > { %v1333_v13 = vpop.xlane.xlu0 %1332 }
 0x3f8   : > { %v1343_v14 = vsub.f32 %v1327_v52, %v1333_v13 }
 0x3fa   : > { %v1347_v15 = vmul.f32 1.442695, %v1343_v14 }
 0x3fc   : > { %2512 = vpow2.f32 %v1347_v15 }
 0x3ff   : > { %v1336_v16 = vpop.xlane.xlu1 %1335 }
 0x400   : > { %v1344_v17 = vsub.f32 %v1328_v3, %v1336_v16 }
 0x402   : > { %v1349_v18 = vmul.f32 1.442695, %v1344_v17 }
 0x404   : > { %2514 = vpow2.f32 %v1349_v18 }
 0x407   : > { %v1339_v20 = vpop.xlane.xlu0 %1338 }
 0x408   : > { %v1345_v29 = vsub.f32 %v1329_v54, %v1339_v20 }
 0x409   : > { %v2950_v19 = vpop.eup %2512 }
 0x40a   : > { %v1355_v30 = vsel %vm1140_vm3, %v2950_v19, 0.0  ;;  %v1351_v32 = vmul.f32 1.442695, %v1345_v29 }
 0x40b   : > { %1356 = vadd.xlane.f32.xlu1 %v1355_v30  ;;  %v1342_v23 = vpop.xlane.xlu0 %1341 }
 0x40c   : > { %v1346_v28 = vsub.f32 %v1330_v62, %v1342_v23 }
 0x40e   : > { %v1353_v31 = vmul.f32 1.442695, %v1346_v28 }
 0x410   : > { %2516 = vpow2.f32 %v1353_v31 }
 0x411   : > { %v2954_v21 = vpop.eup %2514  ;;  %2518 = vpow2.f32 %v1351_v32 }
 0x412   : > { %v1358_v22 = vsel %vm1140_vm3, %v2954_v21, 0.0 }
 0x413   : > { %1359 = vadd.xlane.f32.xlu0 %v1358_v22 }
 0x41c   : > { %974 = vrot.lane.b32.xlu1 %v2860_v25, %s2637_s13 }
 0x41d   : > { %v2961_v33 = vpop.eup %2516 }
 0x41e   : > { %v1364_v34 = vsel %vm1140_vm3, %v2961_v33, 0.0  ;;  %v2965_v35 = vpop.eup %2518 }
 0x41f   : > { %v1361_v25 = vsel %vm1140_vm3, %v2965_v35, 0.0 }
 0x420   : > { %976 = vrot.lane.b32.xlu1 %v2863_v26, %s2637_s13  ;;  %v971_v26 = vpop.permute.xlu1 %970 }
 0x421   : > { %v985_v39 = vrot.slane %v971_v26, %v2870_v36 }
 0x429   : > { %972 = vrot.lane.b32.xlu0 %v2857_v24, %s2637_s13 }
 0x444   : > { %1365 = vadd.xlane.f32.xlu1 %v1364_v34 }
 0x448   : > { %1362 = vadd.xlane.f32.xlu0 %v1361_v25 }
 0x494   : > { %v1357_v24 = vpop.xlane.xlu1 %1356 }
 0x495   : > { %2520 = vrcp.f32 %v1357_v24 }
 0x498   : > { %v975_v37 = vpop.permute.xlu1 %974 }
 0x499   : > { %v993_v38 = vrot.slane %v975_v37, %v2870_v36 }
 0x49b   : > { %v994_v40 = vcombine.low %v985_v39, %v993_v38  ;;  %v995_v42 = vcombine.high %v985_v39, %v993_v38 }
 0x49c   : > { %v1360_v41 = vpop.xlane.xlu0 %1359  ;;  %v977_v43 = vpop.permute.xlu1 %976 }
 0x49d   : > { %v1002_v45 = vrot.slane %v994_v40, %v2877_v44  ;;  %v1027_v47 = vrot.slane %v977_v43, %v2870_v36  ;;  %v1009_v49 = vrot.slane %v995_v42, %v2877_v44  ;;  %2522 = vrcp.f32 %v1360_v41 }
 0x49f   : > { %v1010_v52 = vcombine.high %v1002_v45, %v2636_v56  ;;  %v1011_v58 = vcombine.high %v1009_v49, %v2636_v56  ;;  %v1050_v59 = vshrl.u32 %v1002_v45, 16  ;;  %v1066_v27 = vshrl.u32 %v1009_v49, 16 }
 0x4a0   : > { %v973_v46 = vpop.permute.xlu0 %972 }
 0x4a1   : > { %v1019_v48 = vrot.slane %v973_v46, %v2870_v36  ;;  %v1058_v3 = vshrl.u32 %v1010_v52, 16  ;;  %v1074_v9 = vshrl.u32 %v1011_v58, 16 }
 0x4a2   : > { %v2521_v23 = vpop.eup %2520 }
 0x4a3   : > { %v1028_v50 = vcombine.low %v1019_v48, %v1027_v47  ;;  %v1029_v51 = vcombine.high %v1019_v48, %v1027_v47  ;;  %v1371_v34 = vmul.f32 %v2521_v23, %v2950_v19 }
 0x4a5   : > { %v1036_v55 = vrot.slane %v1028_v50, %v2877_v44  ;;  %v1043_v57 = vrot.slane %v1029_v51, %v2877_v44  ;;  %v1375_v46 = vpack.c.bf16 %v1371_v34, %v1371_v34 }
 0x4a7   : > { %v1044_v60 = vcombine.high %v1036_v55, %v2636_v56  ;;  %v1045_v61 = vcombine.high %v1043_v57, %v2636_v56  ;;  %v1048_v0 = vpack.i.b16 %v1036_v55, %v1002_v45  ;;  %v1051_v2 = vshrl.u32 %v1036_v55, 16 }
 0x4a8   : > { %v1064_v4 = vpack.i.b16 %v1043_v57, %v1009_v49  ;;  %v1067_v6 = vshrl.u32 %v1043_v57, 16 }
 0x4a9   : > { %v1052_v53 = vpack.i.b16 %v1051_v2, %v1050_v59  ;;  %v1056_v7 = vpack.i.b16 %v1044_v60, %v1010_v52  ;;  %v1059_v8 = vshrl.u32 %v1044_v60, 16  ;;  %v1072_v54 = vpack.i.b16 %v1045_v61, %v1011_v58 }
 0x4aa   : > { %v1068_v10 = vpack.i.b16 %v1067_v6, %v1066_v27  ;;  %v1075_v62 = vshrl.u32 %v1045_v61, 16  ;;  %v1078_v11 = vcombine.low %v1048_v0, %v1064_v4  ;;  %v2523_v29 = vpop.eup %2522 }
 0x4ab   : > { %v1060_v63 = vpack.i.b16 %v1059_v8, %v1058_v3  ;;  %v1086_v12 = vcombine.low %v1056_v7, %v1072_v54  ;;  %v1372_v38 = vmul.f32 %v2523_v29, %v2954_v21 }
 0x4ac   : > { %v1076_v13 = vpack.i.b16 %v1075_v62, %v1074_v9  ;;  %v1103_v14 = vcombine.low %v1052_v53, %v1068_v10  ;;  %v1085_v15 = vrot.slane %v1078_v11, %v2870_v36 }
 0x4ad   : > { %v1093_v16 = vrot.slane %v1086_v12, %v2870_v36  ;;  %v1376_v47 = vpack.c.bf16 %v1372_v38, %v1372_v38 }
 0x4ae   : > { %v1111_v17 = vcombine.low %v1060_v63, %v1076_v13  ;;  %v1110_v30 = vrot.slane %v1103_v14, %v2870_v36 }
 0x4af   : > { %v1094_v18 = vcombine.low %v1085_v15, %v1093_v16 }
 0x4b0   : > { %v1118_v22 = vrot.slane %v1111_v17, %v2870_v36 }
 0x4b1   : > { %v1101_v20 = vrot.slane %v1094_v18, %v2877_v44 }
 0x4b2   : > { %v1119_v28 = vcombine.low %v1110_v30, %v1118_v22  ;;  %v2496_v30 = vld [vmem:[%s2797_s22 + $0x8] sm:$0xff]  }
 0x4b3   : > { %v1102_v31 = vcombine.high %v1101_v20, %v2636_v56  ;;  %v1131_v26 = vshrl.u32 %v1101_v20, 16 }
 0x4b4   : > { %v1126_v32 = vrot.slane %v1119_v28, %v2877_v44 }
 0x4b5   : > { %v1137_v39 = vshrl.u32 %v1102_v31, 16 }
 0x4b6   : > { %v1130_v25 = vpack.i.b16 %v1126_v32, %v1101_v20  ;;  %v1132_v24 = vshrl.u32 %v1126_v32, 16  ;;  %v1127_v37 = vcombine.high %v1126_v32, %v2636_v56 }
 0x4b8   : > { %v1384_v40 = vsel %vm1382_vm5, %v1130_v25, 0  ;;  %v1133_v41 = vpack.i.b16 %v1132_v24, %v1131_v26  ;;  %v1136_v42 = vpack.i.b16 %v1127_v37, %v1102_v31  ;;  %v1138_v43 = vshrl.u32 %v1127_v37, 16  ;;  %v2497_v26 = vld [vmem:[%s2797_s22] sm:$0xff]   ;;  %s2638_s22 = smov 16  }
 0x4b9   : > { %2343 = vmatpush3.bf16.msra.mxu1 %v1384_v40 }
 0x4ba   : > { %v1430_v45 = vsel %vm1382_vm5, %v1133_v41, 0  ;;  %2354 = vmatprep.subr.bf16.mxu1 %v2628_v5  ;;  %v1139_v19 = vpack.i.b16 %v1138_v43, %v1137_v39  ;;  %v1476_v56 = vsel %vm1382_vm5, %v1136_v42, 0 }
 0x4bb   : > { %2349 = vmatpush3.bf16.msra.mxu0 %v1430_v45 }
 0x4bc   : > { %2345 = vmatmul.mubr.msk.bf16.vlgmr.msra.gmra.mxu1 %vm1140_vm3, %v1375_v46  ;;  %2360 = vmatprep.subr.bf16.mxu0 %v2628_v5  ;;  %v1522_v21 = vsel %vm1382_vm5, %v1139_v19, 0 }
 0x4bd   : > { %2355 = vmatpush3.bf16.msra.mxu1 %v1476_v56  ;;  %2356 = vmatprep.mubr.msk.bf16.mxu1 %vm2629_vm2, %v2628_v5 }
 0x4be   : > { %2351 = vmatmul.mubr.msk.bf16.vlgmr.msra.gmra.mxu0 %vm1140_vm3, %v1376_v47  ;;  %2366 = vmatprep.subr.bf16.mxu1 %v2628_v5 }
 0x4bf   : > { %2361 = vmatpush3.bf16.msra.mxu0 %v1522_v21  ;;  %2362 = vmatprep.mubr.msk.bf16.mxu0 %vm2629_vm2, %v2628_v5 }
 0x4c0   : > { %2374 = vmatprep.subr.bf16.mxu0 %v2628_v5 }
 0x4cd   : > { %v1366_v48 = vpop.xlane.xlu1 %1365 }
 0x4ce   : > { %2524 = vrcp.f32 %v1366_v48 }
 0x4d1   : > { %v1363_v49 = vpop.xlane.xlu0 %1362 }
 0x4d2   : > { %2526 = vrcp.f32 %v1363_v49 }
 0x4db   : > { %v2525_v50 = vpop.eup %2524 }
 0x4dc   : > { %v1374_v51 = vmul.f32 %v2525_v50, %v2961_v33 }
 0x4de   : > { %v1378_v52 = vpack.c.bf16 %v1374_v51, %v1374_v51 }
 0x4df   : > { %v2527_v55 = vpop.eup %2526 }
 0x4e0   : > { %2363 = vmatmul.mubr.msk.bf16.vlgmr.msra.gmra.mxu0 %vm1140_vm3, %v1378_v52  ;;  %v1373_v57 = vmul.f32 %v2527_v55, %v2965_v35 }
 0x4e1   : > { %2378 = vmatprep.mubr.msk.bf16.mxu0 %vm2629_vm2, %v2628_v5 }
 0x4e2   : > { %v1377_v58 = vpack.c.bf16 %v1373_v57, %v1373_v57 }
 0x4e4   : > { %2357 = vmatmul.mubr.msk.bf16.vlgmr.msra.gmra.mxu1 %vm1140_vm3, %v1377_v58  ;;  %v2245_v58 = vld [vmem:[%s507_s28] ss:$0 sm:$0xff] }
 0x4e5   : > { %2370 = vmatprep.mubr.msk.bf16.mxu1 %vm2629_vm2, %v2628_v5  ;;  %2367 = vmatpush3.bf16.msra.mxu1 %v2496_v30 }
 0x4e6   : > { %2368 = vmatprep.subr.bf16.mxu1 %v2628_v5 }
 0x4e9   : > { %2369 = vmatpush3.bf16.msra.mxu1 %v2497_v26 }
 0x4ea   : > { %2382 = vmatprep.subr.bf16.mxu1 %v2628_v5 }
 0x57c   : > { %v1420_v59 = vpop.f32.mrf.mxu1 }
 0x57e   : > { %v2346_v60 = vpop.f32.mrf.mxu1  ;;  %v1466_v61 = vpop.f32.mrf.mxu0 }
 0x580   : > { %v1423_v0 = vpop.f32.mrf.mxu1  ;;  %v2352_v33 = vpop.f32.mrf.mxu0 }
 0x582   : > { %v2347_v2 = vpop.f32.mrf.mxu1  ;;  %v1469_v3 = vpop.f32.mrf.mxu0 }
 0x584   : > { %v2353_v27 = vpop.f32.mrf.mxu0 }
 0x5a0   : > { %v1558_v4 = vpop.f32.mrf.mxu0 }
 0x5a1   : > { %v1580_v35 = vcombine.low %v1466_v61, %v1558_v4  ;;  %v1581_v53 = vcombine.high %v1466_v61, %v1558_v4  ;;  %v2498_v4 = vld [vmem:[%s2806_s15 + $0x8] sm:$0xff]  }
 0x5a2   : > { %v2364_v6 = vpop.f32.mrf.mxu0  ;;  %2375 = vmatpush3.bf16.msra.mxu0 %v2498_v4 }
 0x5a3   : > { %v1588_v11 = vrot.slane %v1580_v35, %v2870_v36  ;;  %v1595_v63 = vrot.slane %v1581_v53, %v2870_v36  ;;  %v2499_v6 = vld [vmem:[%s2811_s18 + $0x8] sm:$0xff]   ;;  %v2500_v35 = vld [vmem:[%s2806_s15] sm:$0xff]   ;;  %2376 = vmatprep.subr.bf16.mxu0 %v2628_v5  ;;  %s3184_s15 = scalar_lea.vmem %s3144_s2, %s2773_s21  ;;  %s3186_s21 = sld [smem:[#allocation6_spill]] }
 0x5a4   : > { %v1512_v7 = vpop.f32.mrf.mxu1  ;;  %v1561_v8 = vpop.f32.mrf.mxu0  ;;  %v2501_v53 = vld [vmem:[%s2811_s18] sm:$0xff]   ;;  %s3185_s18 = sld [smem:[#allocation8_spill]] }
 0x5a5   : > { %v1564_v54 = vcombine.low %v1420_v59, %v1512_v7  ;;  %v1565_v9 = vcombine.high %v1420_v59, %v1512_v7 }
 0x5a6   : > { %v2358_v10 = vpop.f32.mrf.mxu1  ;;  %v2365_v62 = vpop.f32.mrf.mxu0  ;;  %2377 = vmatpush3.bf16.msra.mxu0 %v2500_v35 }
 0x5a7   : > { %v1572_v12 = vrot.slane %v1564_v54, %v2870_v36  ;;  %v1579_v13 = vrot.slane %v1565_v9, %v2870_v36  ;;  %2390 = vmatprep.subr.bf16.mxu0 %v2628_v5  ;;  %v2249_v9 = vld [vmem:[%s3184_s15] ss:$0 sm:$0xff] }
 0x5a8   : > { %v1515_v14 = vpop.f32.mrf.mxu1 }
 0x5a9   : > { %v1596_v15 = vcombine.low %v1572_v12, %v1588_v11  ;;  %v1597_v16 = vcombine.high %v1572_v12, %v1588_v11  ;;  %v1612_v17 = vcombine.low %v1579_v13, %v1595_v63  ;;  %v1613_v18 = vcombine.high %v1579_v13, %v1595_v63  ;;  %v2502_v63 = vld [vmem:[%s2817_s17 + $0x38] sm:$0xff]   ;;  %v2503_v12 = vld [vmem:[%s2817_s17 + $0x30] sm:$0xff]   ;;  %v2504_v13 = vld [vmem:[%s2817_s17 + $0x28] sm:$0xff]   ;;  %s3190_s30 = sand.u32 1, %s3186_s21  }
 0x5aa   : > { %v2359_v22 = vpop.f32.mrf.mxu1  ;;  %v2505_v14 = vld [vmem:[%s2817_s17 + $0x20] sm:$0xff]   ;;  %s2265_s10 = sshll.u32 %s3185_s18, 7  ;;  %s2033_s13 = scalar_lea.sflag [#allocation3], %s3190_s30 }
 0x5ab   : > { %v1604_v20 = vrot.slane %v1596_v15, %v2877_v44  ;;  %v1611_v23 = vrot.slane %v1597_v16, %v2877_v44  ;;  %v1620_v28 = vrot.slane %v1612_v17, %v2877_v44  ;;  %v1627_v29 = vrot.slane %v1613_v18, %v2877_v44  ;;  %v2506_v15 = vld [vmem:[%s2817_s17 + $0x18] sm:$0xff]   ;;  %v2507_v16 = vld [vmem:[%s2817_s17 + $0x10] sm:$0xff]   ;;  %v2508_v17 = vld [vmem:[%s2817_s17 + $0x8] sm:$0xff]   ;;  %s3086_s29 = scalar_lea.hbm %s3188_s19, %s2265_s10 }
 0x5ac   : > { %v2509_v18 = vld [vmem:[%s2817_s17] sm:$0xff]  }
 0x5ad   : > { %v1632_v31 = vcombine.low %v1604_v20, %v1611_v23  ;;  %v2243_v32 = vcombine.high %v1604_v20, %v1611_v23  ;;  %v1648_v34 = vcombine.low %v1620_v28, %v1627_v29  ;;  %v2244_v25 = vcombine.high %v1620_v28, %v1627_v29 }
 0x5af   : > { %v1639_v24 = vrot.slane %v1632_v31, %v2870_v36  ;;  %v1647_v37 = vrot.slane %v2243_v32, %v2870_v36  ;;  %v1655_v38 = vrot.slane %v1648_v34, %v2870_v36  ;;  %v1663_v39 = vrot.slane %v2244_v25, %v2870_v36 }
 0x5b1   : > { %v1665_v40 = vcombine.high %v1639_v24, %v1647_v37  ;;  %v1681_v41 = vcombine.high %v1655_v38, %v1663_v39  ;;  %v1664_v42 = vcombine.low %v1639_v24, %v1647_v37  ;;  %v1680_v43 = vcombine.low %v1655_v38, %v1663_v39 }
 0x5b3   : > { %v1679_v45 = vrot.slane %v1665_v40, %v2877_v44  ;;  %v1695_v46 = vrot.slane %v1681_v41, %v2877_v44  ;;  %v1672_v19 = vrot.slane %v1664_v42, %v2877_v44  ;;  %v1688_v56 = vrot.slane %v1680_v43, %v2877_v44 }
 0x5b5   : > { %v1698_v47 = vcombine.low %v1679_v45, %v1695_v46  ;;  %v1697_v21 = vcombine.high %v1672_v19, %v1688_v56  ;;  %v1696_v48 = vcombine.low %v1672_v19, %v1688_v56  ;;  %v1699_v36 = vcombine.high %v1679_v45, %v1695_v46 }
 0x5b7   : > { %1705 = vrot.lane.b32.xlu1 %v1698_v47, %s2638_s22  ;;  %1701 = vrot.lane.b32.xlu0 %v1697_v21, %s2639_s20  ;;  %s2534_s22 = scalar_lea.vmem %s3088_s26, 128  ;;  %s2641_s20 = smov [#allocation2]  }
 0x5b8   : > { %p2535_p1 = scmp.ne.s32.totalorder %s3088_s26, %s2534_s22 }
 0x5ba   : > { %p2536_p2 = pnand %p2535_p1, %p2746_p3 }
 0x5bb   : > { %1709 = vrot.lane.b32.xlu0 %v1699_v36, %s2640_s14  ;;  %s2538_s14 = sshll.u32 %s2641_s20, 4  ;;  %s2539_s14 = int_to_ptr.vmem [resolvable:$false] %s2538_s14 }
 0x5bc   : > { %p2537_p4 = pneg %p2536_p2  ;;  %s2540_s25 = scalar_lea.vmem %s2539_s14, 256 }
 0x5bd   : > { %p2541_p5 = scmp.lt.s32.totalorder %s3088_s26, %s2539_s14  ;;  %p2542_p6 = scmp.lt.s32.totalorder %s2540_s25, %s2534_s22 }
 0x5bf   : > { %p2543_p7 = por %p2542_p6, %p2541_p5 }
 0x5c1   : > { %p2544_p8 = pnand %p2543_p7, %p2537_p4 }
 0x629   : > { %v1702_v49 = vpop.permute.xlu0 %1701  ;;  %v1706_v50 = vpop.permute.xlu1 %1705 }
 0x62a   : > { %v1712_v51 = vsel %vm1140_vm3, %v1696_v48, %v1702_v49 }
 0x62b   : > { %v1714_v44 = vsel %vm1713_vm6, %v1712_v51, %v1706_v50 }
 0x62d   : > { %v1710_v52 = vpop.permute.xlu0 %1709 }
 0x62e   : > { %v1716_v55 = vsel %vm1715_vm7, %v1714_v44, %v1710_v52 }
 0x62f   : > { %v1717_v57 = vpack.c.bf16 %v1716_v55, %v1716_v55 }
 0x631   : > { %2371 = vmatmul.mubr.msk.bf16.vlgmr.msra.gmra.mxu1 %vm539_vm1, %v1717_v57 }
 0x632   : > { %2386 = vmatprep.mubr.msk.bf16.mxu1 %vm2629_vm2, %v2628_v5  ;;  %2383 = vmatpush3.bf16.msra.mxu1 %v2499_v6 }
 0x633   : > { %2384 = vmatprep.subr.bf16.mxu1 %v2628_v5 }
 0x636   : > { %2385 = vmatpush3.bf16.msra.mxu1 %v2501_v53 }
 0x6f1   : > { %v1778_v59 = vpop.f32.mrf.mxu1 }
 0x6f2   : > { %v1779_v60 = vadd.f32 %v2245_v58, %v1778_v59 }
 0x6f3   : > { %v2372_v61 = vpop.f32.mrf.mxu1 }
 0x6f4   : > { %v3043_v0 = vadd.f32 %v1779_v60, %v2824_v1 }
 0x6f5   : > { %v1781_v33 = vpop.f32.mrf.mxu1 }
 0x6f6   : > { %v1786_v2 = vmul.f32 %v3043_v0, %v3043_v0 }
 0x6f7   : > { %v2373_v3 = vpop.f32.mrf.mxu1 }
 0x6f8   : > { %v1787_v27 = vsel %vm539_vm1, %v1786_v2, 0.0 }
 0x6f9   : > { %1788 = vadd.xlane.f32.xlu1 %v1787_v27 }
 0x782   : > { %v1789_v1 = vpop.xlane.xlu1 %1788 }
 0x783   : > { %v1790_v7 = vmul.f32 0.03125, %v1789_v1 }
 0x785   : > { %v1791_v8 = vadd.f32 1.1920929e-07, %v1790_v7 }
 0x787   : > { %2528 = vrsqrt.f32 %v1791_v8 }
 0x794   : > { %v2529_v54 = vpop.eup %2528 }
 0x795   : > { %v1793_v10 = vmul.f32 %v2529_v54, %v3043_v0 }
 0x797   : > { %v1800_v62 = vmul.f32 %v2249_v9, %v1793_v10 }
 0x799   : > { %v1801_v11 = vpack.c.bf16 %v1800_v62, %v1800_v62 }
 0x79b   : > { %2379 = vmatmul.mubr.msk.bf16.vlgmr.msra.gmra.mxu0 %vm539_vm1, %v1801_v11  ;;  %2387 = vmatmul.mubr.msk.bf16.vlgmr.msra.gmra.mxu1 %vm539_vm1, %v1801_v11 }
 0x79c   : > { %2406 = vmatprep.mubr.msk.bf16.mxu0 %vm2629_vm2, %v2628_v5  ;;  %2391 = vmatpush3.bf16.msra.mxu0 %v2502_v63 }
 0x79d   : > { %2392 = vmatprep.subr.bf16.mxu0 %v2628_v5 }
 0x7a0   : > { %2393 = vmatpush3.bf16.msra.mxu0 %v2503_v12 }
 0x7a1   : > { %2394 = vmatprep.subr.bf16.mxu0 %v2628_v5 }
 0x7a4   : > { %2395 = vmatpush3.bf16.msra.mxu0 %v2504_v13 }
 0x7a5   : > { %2396 = vmatprep.subr.bf16.mxu0 %v2628_v5 }
 0x7a8   : > { %2397 = vmatpush3.bf16.msra.mxu0 %v2505_v14 }
 0x7a9   : > { %2398 = vmatprep.subr.bf16.mxu0 %v2628_v5 }
 0x7ac   : > { %2399 = vmatpush3.bf16.msra.mxu0 %v2506_v15 }
 0x7ad   : > { %2400 = vmatprep.subr.bf16.mxu0 %v2628_v5 }
 0x7b0   : > { %2401 = vmatpush3.bf16.msra.mxu0 %v2507_v16 }
 0x7b1   : > { %2402 = vmatprep.subr.bf16.mxu0 %v2628_v5 }
 0x7b4   : > { %2403 = vmatpush3.bf16.msra.mxu0 %v2508_v17 }
 0x7b5   : > { %2404 = vmatprep.subr.bf16.mxu0 %v2628_v5 }
 0x7b8   : > { %2405 = vmatpush3.bf16.msra.mxu0 %v2509_v18 }
 0x85b   : > { %v1855_v30 = vpop.f32.mrf.mxu0  ;;  %v1911_v22 = vpop.f32.mrf.mxu1 }
 0x85c   : > { %v1917_v20 = vsub.f32 0.0, %v1855_v30 }
 0x85d   : > { %v2380_v23 = vpop.f32.mrf.mxu0  ;;  %v2388_v28 = vpop.f32.mrf.mxu1 }
 0x85e   : > { %v1918_v29 = vmul.f32 1.442695, %v1917_v20 }
 0x85f   : > { %v1858_v31 = vpop.f32.mrf.mxu0  ;;  %v1914_v32 = vpop.f32.mrf.mxu1 }
 0x860   : > { %2530 = vpow2.f32 %v1918_v29 }
 0x861   : > { %v2381_v34 = vpop.f32.mrf.mxu0  ;;  %v2389_v25 = vpop.f32.mrf.mxu1 }
 0x86d   : > { %v2531_v26 = vpop.eup %2530 }
 0x86e   : > { %v1920_v24 = vadd.f32 1.0, %v2531_v26 }
 0x870   : > { %2532 = vrcp.f32 %v1920_v24 }
 0x87d   : > { %v2533_v5 = vpop.eup %2532 }
 0x87e   : > { %v1923_v37 = vmul.f32 %v2533_v5, %v1855_v30 }
 0x880   : > { %v1924_v38 = vmul.f32 %v1923_v37, %v1911_v22 }
 0x882   : > { %v1925_v39 = vpack.c.bf16 %v1924_v38, %v1924_v38 }
 0x884   : > { %2407 = vmatmul.mubr.bf16.vlgmr.msra.gmra.mxu0 %v1925_v39 }
 0x944   : > { %v2024_v40 = vpop.f32.mrf.mxu0 }
 0x945   : > { %v2030_v41 = vadd.f32 %v2024_v40, %v3043_v0 }
 0x946   : > { %v2408_v42 = vpop.f32.mrf.mxu0 }
 0x947   : > { %2031 = vst.msk [vmem:[%s2819_s27] sm:$0xff] %vm539_vm1, %v2030_v41 }
 0x948   : > { %v2027_v43 = vpop.f32.mrf.mxu0 }
 0x949   : > { %2547 = shalt.err (!%p2544_p8)
}
 0x94a   : > { %s2548_s27 = scalar_lea.hbm %s3086_s29, 128  ;;  %s2552_s24 = scalar_lea.hbm %s3189_s23, 256 }
 0x94b   : > { %p2549_p10 = scmp.ne.s32.totalorder %s3086_s29, %s2548_s27  ;;  %p2553_p13 = scmp.lt.s32.totalorder %s3086_s29, %s3189_s23 }
 0x94c   : > { %p2554_p0 = scmp.lt.s32.totalorder %s2552_s24, %s2548_s27 }
 0x94d   : > { %p2550_p11 = pnand %p2549_p10, %p2746_p3 }
 0x94e   : > { %p2555_p1 = por %p2554_p0, %p2553_p13 }
 0x94f   : > { %p2551_p12 = pneg %p2550_p11 }
 0x951   : > { %p2556_p2 = pnand %p2555_p1, %p2551_p12 }
 0x953   : > { %2559 = shalt.err (!%p2556_p2)
}
 0x954   : > { %2410 = dma.vmem_to_hbm [thread:$0]  (%p2746_p3), %s3088_s26, 128, %s3086_s29, %s2033_s13   ;;  %v2409_v45 = vpop.f32.mrf.mxu0 }
 0x955 PF: > { %s3191_s21 = sld [smem:[#allocation11_spill]] }
 0x956   : > { %s3192_s10 = sld [smem:[#allocation5_spill]] }
 0x95b   : > { %p2416_p4 = scmp.ge.s32.totalorder %s3191_s21, 2 }
 0x95c   : > { %s2058_s12 = sand.u32 1, %s3192_s10  }
 0x95d   : > { %p2413_p5 = pnand %p2416_p4, %p2756_p9  ;;  %s2059_s19 = scalar_lea.sflag [#allocation3], %s2058_s12 }
 0x95f   : > { %p2414_p6 = pneg %p2413_p5 }
 0x961   : > { %2593 = dma.done.wait (%p2414_p6), %s2059_s19, 128  }
 0x962   : > { %2595 = vsyncadd (%p2414_p6), %s2059_s19, 4294967168  ;;  %s23_s20 = sadd.s32 1, %s3191_s21   ;;  %s3194_s13 = sld [smem:[#allocation6_spill]] }
 0x963   : > { %p20_p7 = scmp.ge.s32.totalorder %s23_s20, 6   ;;  %s3195_s14 = sld [smem:[#allocation7_spill]] }
 0x964   : > { %s3196_s15 = sld [smem:[#allocation16_spill]] }
 0x965   : > { %s3197_s16 = sld [smem:[#allocation9_spill]]  ;;  %22 = sbr.rel (!%p20_p7) target bundleno = 7 (0x7), region = 126 }
 0x966   : > { %s3198_s17 = sld [smem:[#allocation10_spill]] }
 0x967   : > { %s3199_s18 = sld [smem:[#allocation12_spill]] }
 0x968   : > { %s3200_s19 = sld [smem:[#allocation14_spill]] }
 0x96a   :  { %2064 = vsyncpa [#allocation3], 1 }
 0x96b   :  { %2066 = vsyncpa [#allocation3 + $0x1], 1 }

</bundles_post_ra>
